<compile_context>
chip_gen: v5e
topology: v5e:2x2
jax: 0.10.0
libtpu: 0.0.40
codegen_flags: <defaults>
</compile_context>

<pallas_src>
import jax
import jax.numpy as jnp
import numpy as np
from jax.experimental import pallas as pl
from jax.experimental.pallas import tpu as pltpu


def _round_up(n, m):
    return ((n + m - 1) // m) * m


def _ffn_kernel(x_ref, w1_ref, b1_ref, w2_ref, b2_ref, o_ref):
    # x_ref: (tm, D) bf16 tile of flattened tokens; weights resident in VMEM.
    x = x_ref[...]                                # bf16 (tm, D)   — MXU-native
    w1 = w1_ref[...]                              # bf16 (D, Dff)
    w2 = w2_ref[...]                              # bf16 (Dff, D)
    b1 = b1_ref[...].astype(jnp.float32)          # f32  (1, Dff)
    b2 = b2_ref[...].astype(jnp.float32)          # f32  (1, D)

    # w_1: bf16 matmul, f32 accumulate; bias + ReLU in f32 on the VPU.
    h = jnp.dot(x, w1, preferred_element_type=jnp.float32) + b1
    h = jnp.maximum(h, 0.0)
    # (dropout == identity in eval mode)
    # w_2: cast activations back to bf16 for the MXU, accumulate in f32.
    y = jnp.dot(h.astype(jnp.bfloat16), w2, preferred_element_type=jnp.float32) + b2
    o_ref[...] = y.astype(o_ref.dtype)


def _build_ffn_call(rows_p, tm, D, Dff, out_dtype, vmem_limit, single_buffer_weights):
    resident = {"pipeline_mode": pl.Buffered(1)} if single_buffer_weights else {}
    return pl.pallas_call(
        _ffn_kernel,
        out_shape=jax.ShapeDtypeStruct((rows_p, D), out_dtype),
        grid_spec=pltpu.PrefetchScalarGridSpec(
            num_scalar_prefetch=0,
            grid=(rows_p // tm,),
            in_specs=[
                pl.BlockSpec((tm, D), lambda i: (i, 0)),                # x tile (streams)
                pl.BlockSpec((D, Dff), lambda i: (0, 0), **resident),   # W1 (resident)
                pl.BlockSpec((1, Dff), lambda i: (0, 0), **resident),   # b1
                pl.BlockSpec((Dff, D), lambda i: (0, 0), **resident),   # W2 (resident)
                pl.BlockSpec((1, D), lambda i: (0, 0), **resident),     # b2
            ],
            out_specs=pl.BlockSpec((tm, D), lambda i: (i, 0)),
        ),
        compiler_params=pltpu.CompilerParams(
            dimension_semantics=("parallel",),      # row tiles shard across TCs (v7x)
            vmem_limit_bytes=vmem_limit,
        ),
    )


def positionwise_ffn(x, params, *, tm=256):
    """x: [..., d_model] float32 -> [..., d_model] float32."""
    w1, b1, w2, b2 = params
    D = x.shape[-1]
    Dff = w1.shape[1]
    orig_shape = x.shape

    # Flatten tokens to rows so d_model maps to the 128-lane axis.
    x2d = x.reshape(-1, D)
    rows = x2d.shape[0]

    # Row tile: multiple of 8 sublanes, as large as the problem allows (<= tm).
    tm = max(8, min(tm, _round_up(rows, 8)))
    rows_p = _round_up(rows, tm)
    if rows_p != rows:
        x2d = jnp.pad(x2d, ((0, rows_p - rows), (0, 0)))

    # bf16 MXU operands (f32 accumulation in-kernel); biases stay f32.
    x_bf = x2d.astype(jnp.bfloat16)
    w1_bf = w1.astype(jnp.bfloat16)
    w2_bf = w2.astype(jnp.bfloat16)
    b1_2d = b1.reshape(1, Dff).astype(jnp.float32)
    b2_2d = b2.reshape(1, D).astype(jnp.float32)

    # Explicit VMEM budget: single-buffered bf16 weights + double-buffered x/out
    # tiles + f32 intermediates, 2x headroom, capped below v7x's 64 MiB physical VMEM.
    needed = (
        2 * (D * Dff + Dff * D)          # bf16 W1 + W2 (single buffer)
        + 4 * 2 * (Dff + D)              # f32 biases (tiny)
        + 2 * 2 * tm * D                 # bf16 x tile, double-buffered
        + 2 * 4 * tm * D                 # f32 out tile, double-buffered
        + 4 * tm * (Dff + D)             # f32 h / y intermediates
    )
    vmem_limit = int(min(max(2 * needed, 16 * 1024 * 1024), 64 * 1024 * 1024))

    args = (x_bf, w1_bf, b1_2d, w2_bf, b2_2d)
    try:
        call = _build_ffn_call(rows_p, tm, D, Dff, x.dtype, vmem_limit, True)
        out2d = jax.block_until_ready(call(*args))
    except Exception:
        # Fallback: default (double-buffered) constant blocks if pipeline_mode /
        # pl.Buffered(1) is not supported by this jax version's lowering.
        call = _build_ffn_call(rows_p, tm, D, Dff, x.dtype, vmem_limit, False)
        out2d = jax.block_until_ready(call(*args))

    return out2d[:rows].reshape(orig_shape)


def ffn_reference(x, params):
    """Pure-JAX f32 reference mirroring the PyTorch forward (eval mode)."""
    w1, b1, w2, b2 = params
    h = jnp.maximum(x @ w1 + b1, 0.0)
    return h @ w2 + b2


def init_params(key, d_model, d_ff):
    k1, k2, k3, k4 = jax.random.split(key, 4)
    w1 = jax.random.normal(k1, (d_model, d_ff), jnp.float32) / np.sqrt(d_model)
    b1 = 0.1 * jax.random.normal(k2, (d_ff,), jnp.float32)
    w2 = jax.random.normal(k3, (d_ff, d_model), jnp.float32) / np.sqrt(d_ff)
    b2 = 0.1 * jax.random.normal(k4, (d_model,), jnp.float32)
    return (w1, b1, w2, b2)


if __name__ == "__main__":
    # Small but lane-dense shapes: batch=2, seq=8, d_model=128, d_ff=256.
    B, S, D, Dff = 2, 8, 128, 256

    key = jax.random.PRNGKey(0)
    kx, kp = jax.random.split(key)
    x = jax.random.normal(kx, (B, S, D), jnp.float32)
    params = init_params(kp, D, Dff)

    out = positionwise_ffn(x, params)
    out = jax.block_until_ready(out)

    ref = jax.block_until_ready(ffn_reference(x, params))
    # bf16 MXU operands (f32 accumulation) => looser tolerance than pure f32.
    np.testing.assert_allclose(np.asarray(out), np.asarray(ref),
                               rtol=2e-2, atol=2e-2)
    print("KERNEL_OK")
</pallas_src>

<mosaic_0001>
module attributes {stable_mosaic.version = 11 : i64} {
  func.func @_ffn_kernel(%arg0: i32, %arg1: memref<16x128xbf16, #tpu.memory_space<vmem>>, %arg2: memref<128x256xbf16, #tpu.memory_space<vmem>>, %arg3: memref<1x256xf32, #tpu.memory_space<vmem>>, %arg4: memref<256x128xbf16, #tpu.memory_space<vmem>>, %arg5: memref<1x128xf32, #tpu.memory_space<vmem>>, %arg6: memref<16x128xf32, #tpu.memory_space<vmem>>) attributes {dimension_semantics = [#tpu.dimension_semantics<parallel>], iteration_bounds = array<i64: 1>, scalar_prefetch = 0 : i64, scratch_operands = 0 : i64, tpu.core_type = #tpu.core_type<tc>, window_params = [{transform_indices = @transform_0, window_bounds = array<i64: 16, 128>}, {pipeline_mode = #tpu.pipeline_mode<synchronous>, transform_indices = @transform_1, window_bounds = array<i64: 128, 256>}, {pipeline_mode = #tpu.pipeline_mode<synchronous>, transform_indices = @transform_2, window_bounds = array<i64: 1, 256>}, {pipeline_mode = #tpu.pipeline_mode<synchronous>, transform_indices = @transform_3, window_bounds = array<i64: 256, 128>}, {pipeline_mode = #tpu.pipeline_mode<synchronous>, transform_indices = @transform_4, window_bounds = array<i64: 1, 128>}, {transform_indices = @transform_5, window_bounds = array<i64: 16, 128>}]} {
    %c0 = arith.constant 0 : index
    %c0_0 = arith.constant 0 : index
    %0 = vector.load %arg1[%c0, %c0_0] : memref<16x128xbf16, #tpu.memory_space<vmem>>, vector<16x128xbf16>
    %c0_1 = arith.constant 0 : index
    %c0_2 = arith.constant 0 : index
    %1 = vector.load %arg2[%c0_1, %c0_2] : memref<128x256xbf16, #tpu.memory_space<vmem>>, vector<128x256xbf16>
    %c0_3 = arith.constant 0 : index
    %c0_4 = arith.constant 0 : index
    %2 = vector.load %arg4[%c0_3, %c0_4] : memref<256x128xbf16, #tpu.memory_space<vmem>>, vector<256x128xbf16>
    %c0_5 = arith.constant 0 : index
    %c0_6 = arith.constant 0 : index
    %3 = vector.load %arg3[%c0_5, %c0_6] : memref<1x256xf32, #tpu.memory_space<vmem>>, vector<1x256xf32>
    %c0_7 = arith.constant 0 : index
    %c0_8 = arith.constant 0 : index
    %4 = vector.load %arg5[%c0_7, %c0_8] : memref<1x128xf32, #tpu.memory_space<vmem>>, vector<1x128xf32>
    %cst = arith.constant dense<0.000000e+00> : vector<16x256xf32>
    %5 = tpu.matmul %0, %1, %cst {dimension_numbers = #tpu.dot_dimension_numbers<[1], [0], [0], [1], [0, 0, 1, 1], [], []>} : vector<16x128xbf16>, vector<128x256xbf16>, vector<16x256xf32> -> vector<16x256xf32>
    %6 = vector.broadcast %3 : vector<1x256xf32> to vector<16x256xf32>
    %7 = arith.addf %5, %6 : vector<16x256xf32>
    %cst_9 = arith.constant 0.000000e+00 : f32
    %8 = vector.broadcast %cst_9 : f32 to vector<16x256xf32>
    %9 = arith.maximumf %7, %8 : vector<16x256xf32>
    %10 = arith.truncf %9 : vector<16x256xf32> to vector<16x256xbf16>
    %cst_10 = arith.constant dense<0.000000e+00> : vector<16x128xf32>
    %11 = tpu.matmul %10, %2, %cst_10 {dimension_numbers = #tpu.dot_dimension_numbers<[1], [0], [0], [1], [0, 0, 1, 1], [], []>} : vector<16x256xbf16>, vector<256x128xbf16>, vector<16x128xf32> -> vector<16x128xf32>
    %12 = vector.broadcast %4 : vector<1x128xf32> to vector<16x128xf32>
    %13 = arith.addf %11, %12 : vector<16x128xf32>
    %c0_11 = arith.constant 0 : index
    %c0_12 = arith.constant 0 : index
    %14 = vector.load %arg6[%c0_11, %c0_12] : memref<16x128xf32, #tpu.memory_space<vmem>>, vector<16x128xf32>
    tpu.vector_store %arg6[%c0_11, %c0_12], %13 {strides = array<i32>} : memref<16x128xf32, #tpu.memory_space<vmem>>, vector<16x128xf32>,
    return
  }
  func.func @transform_0(%arg0: i32) -> (i32, i32) {
    %c0_i32 = arith.constant 0 : i32
    %c0_i32_0 = arith.constant 0 : i32
    return %arg0, %c0_i32 : i32, i32
  }
  func.func @transform_1(%arg0: i32) -> (i32, i32) {
    %c0_i32 = arith.constant 0 : i32
    %c0_i32_0 = arith.constant 0 : i32
    %c0_i32_1 = arith.constant 0 : i32
    return %c0_i32, %c0_i32_0 : i32, i32
  }
  func.func @transform_2(%arg0: i32) -> (i32, i32) {
    %c0_i32 = arith.constant 0 : i32
    %c0_i32_0 = arith.constant 0 : i32
    %c0_i32_1 = arith.constant 0 : i32
    return %c0_i32, %c0_i32_0 : i32, i32
  }
  func.func @transform_3(%arg0: i32) -> (i32, i32) {
    %c0_i32 = arith.constant 0 : i32
    %c0_i32_0 = arith.constant 0 : i32
    %c0_i32_1 = arith.constant 0 : i32
    return %c0_i32, %c0_i32_0 : i32, i32
  }
  func.func @transform_4(%arg0: i32) -> (i32, i32) {
    %c0_i32 = arith.constant 0 : i32
    %c0_i32_0 = arith.constant 0 : i32
    %c0_i32_1 = arith.constant 0 : i32
    return %c0_i32, %c0_i32_0 : i32, i32
  }
  func.func @transform_5(%arg0: i32) -> (i32, i32) {
    %c0_i32 = arith.constant 0 : i32
    %c0_i32_0 = arith.constant 0 : i32
    return %arg0, %c0_i32 : i32, i32
  }
}

module attributes {stable_mosaic.version = 11 : i64} {
  func.func @_ffn_kernel(%arg0: i32, %arg1: memref<16x128xbf16, #tpu.memory_space<vmem>>, %arg2: memref<128x256xbf16, #tpu.memory_space<vmem>>, %arg3: memref<1x256xf32, #tpu.memory_space<vmem>>, %arg4: memref<256x128xbf16, #tpu.memory_space<vmem>>, %arg5: memref<1x128xf32, #tpu.memory_space<vmem>>, %arg6: memref<16x128xf32, #tpu.memory_space<vmem>>) attributes {dimension_semantics = [#tpu.dimension_semantics<parallel>], iteration_bounds = array<i64: 1>, scalar_prefetch = 0 : i64, scratch_operands = 0 : i64, tpu.core_type = #tpu.core_type<tc>, window_params = [{transform_indices = @transform_0, window_bounds = array<i64: 16, 128>}, {pipeline_mode = #tpu.pipeline_mode<synchronous>, transform_indices = @transform_1, window_bounds = array<i64: 128, 256>}, {pipeline_mode = #tpu.pipeline_mode<synchronous>, transform_indices = @transform_2, window_bounds = array<i64: 1, 256>}, {pipeline_mode = #tpu.pipeline_mode<synchronous>, transform_indices = @transform_3, window_bounds = array<i64: 256, 128>}, {pipeline_mode = #tpu.pipeline_mode<synchronous>, transform_indices = @transform_4, window_bounds = array<i64: 1, 128>}, {transform_indices = @transform_5, window_bounds = array<i64: 16, 128>}]} {
    %c0 = arith.constant 0 : index
    %c0_0 = arith.constant 0 : index
    %0 = vector.load %arg1[%c0, %c0_0] : memref<16x128xbf16, #tpu.memory_space<vmem>>, vector<16x128xbf16>
    %c0_1 = arith.constant 0 : index
    %c0_2 = arith.constant 0 : index
    %1 = vector.load %arg2[%c0_1, %c0_2] : memref<128x256xbf16, #tpu.memory_space<vmem>>, vector<128x256xbf16>
    %c0_3 = arith.constant 0 : index
    %c0_4 = arith.constant 0 : index
    %2 = vector.load %arg4[%c0_3, %c0_4] : memref<256x128xbf16, #tpu.memory_space<vmem>>, vector<256x128xbf16>
    %c0_5 = arith.constant 0 : index
    %c0_6 = arith.constant 0 : index
    %3 = vector.load %arg3[%c0_5, %c0_6] : memref<1x256xf32, #tpu.memory_space<vmem>>, vector<1x256xf32>
    %c0_7 = arith.constant 0 : index
    %c0_8 = arith.constant 0 : index
    %4 = vector.load %arg5[%c0_7, %c0_8] : memref<1x128xf32, #tpu.memory_space<vmem>>, vector<1x128xf32>
    %cst = arith.constant dense<0.000000e+00> : vector<16x256xf32>
    %5 = tpu.matmul %0, %1, %cst {dimension_numbers = #tpu.dot_dimension_numbers<[1], [0], [0], [1], [0, 0, 1, 1], [], []>} : vector<16x128xbf16>, vector<128x256xbf16>, vector<16x256xf32> -> vector<16x256xf32>
    %6 = vector.broadcast %3 : vector<1x256xf32> to vector<16x256xf32>
    %7 = arith.addf %5, %6 : vector<16x256xf32>
    %cst_9 = arith.constant 0.000000e+00 : f32
    %8 = vector.broadcast %cst_9 : f32 to vector<16x256xf32>
    %9 = arith.maximumf %7, %8 : vector<16x256xf32>
    %10 = arith.truncf %9 : vector<16x256xf32> to vector<16x256xbf16>
    %cst_10 = arith.constant dense<0.000000e+00> : vector<16x128xf32>
    %11 = tpu.matmul %10, %2, %cst_10 {dimension_numbers = #tpu.dot_dimension_numbers<[1], [0], [0], [1], [0, 0, 1, 1], [], []>} : vector<16x256xbf16>, vector<256x128xbf16>, vector<16x128xf32> -> vector<16x128xf32>
    %12 = vector.broadcast %4 : vector<1x128xf32> to vector<16x128xf32>
    %13 = arith.addf %11, %12 : vector<16x128xf32>
    %c0_11 = arith.constant 0 : index
    %c0_12 = arith.constant 0 : index
    %14 = vector.load %arg6[%c0_11, %c0_12] : memref<16x128xf32, #tpu.memory_space<vmem>>, vector<16x128xf32>
    tpu.vector_store %arg6[%c0_11, %c0_12], %13 {strides = array<i32>} : memref<16x128xf32, #tpu.memory_space<vmem>>, vector<16x128xf32>,
    return
  }
  func.func @transform_0(%arg0: i32) -> (i32, i32) {
    %c0_i32 = arith.constant 0 : i32
    %c0_i32_0 = arith.constant 0 : i32
    return %arg0, %c0_i32 : i32, i32
  }
  func.func @transform_1(%arg0: i32) -> (i32, i32) {
    %c0_i32 = arith.constant 0 : i32
    %c0_i32_0 = arith.constant 0 : i32
    %c0_i32_1 = arith.constant 0 : i32
    return %c0_i32, %c0_i32_0 : i32, i32
  }
  func.func @transform_2(%arg0: i32) -> (i32, i32) {
    %c0_i32 = arith.constant 0 : i32
    %c0_i32_0 = arith.constant 0 : i32
    %c0_i32_1 = arith.constant 0 : i32
    return %c0_i32, %c0_i32_0 : i32, i32
  }
  func.func @transform_3(%arg0: i32) -> (i32, i32) {
    %c0_i32 = arith.constant 0 : i32
    %c0_i32_0 = arith.constant 0 : i32
    %c0_i32_1 = arith.constant 0 : i32
    return %c0_i32, %c0_i32_0 : i32, i32
  }
  func.func @transform_4(%arg0: i32) -> (i32, i32) {
    %c0_i32 = arith.constant 0 : i32
    %c0_i32_0 = arith.constant 0 : i32
    %c0_i32_1 = arith.constant 0 : i32
    return %c0_i32, %c0_i32_0 : i32, i32
  }
  func.func @transform_5(%arg0: i32) -> (i32, i32) {
    %c0_i32 = arith.constant 0 : i32
    %c0_i32_0 = arith.constant 0 : i32
    return %arg0, %c0_i32 : i32, i32
  }
}

</mosaic_0001>

<bundles_post_ra>
// kernel: tpu_custom_call.1
= control target key start
LH: loop header
LB: loop body
LE: loop exit
PB: predicated region body
PF: predicated region fallthrough
CT: control target
= control target key end

     0   :  { %10 = vsyncpa [#allocation3], 0  ;;  %s775_s0 = inlined_call_operand.hbm [shape: bf16[16,128], index: 0, kind: input, shape index: {}]   ;;  %s776_s1 = inlined_call_operand.hbm [shape: bf16[128,256], index: 1, kind: input, shape index: {}]   ;;  %s777_s2 = inlined_call_operand.hbm [shape: f32[1,256], index: 2, kind: input, shape index: {}]   ;;  %s778_s3 = inlined_call_operand.hbm [shape: bf16[256,128], index: 3, kind: input, shape index: {}]   ;;  %s779_s4 = inlined_call_operand.vmem [shape: f32[1,128], index: 4, kind: input, shape index: {}]   ;;  %s780_s5 = inlined_call_operand.hbm [shape: f32[16,128], index: 5, kind: output, shape index: {}]  }
   0x1   :  { %11 = vsyncpa [#allocation6], 0 }
   0x2   :  { %12 = vsyncpa [#allocation9], 0  ;;  %s31_s20 = sshll.u32 %s776_s1, 4  ;;  %s32_s20 = int_to_ptr.hbm [resolvable:$true] %s31_s20 }
   0x3   :  { %13 = vsyncpa [#allocation4], 0  ;;  %s712_s21 = smov [#allocation5]   ;;  %s18_s25 = sshll.u32 %s775_s0, 4  ;;  %s19_s25 = int_to_ptr.hbm [resolvable:$true] %s18_s25 }
   0x4   :  { %s33_s22 = sshll.u32 %s712_s21, 4  ;;  %s713_s26 = smov 128   ;;  %s34_s22 = int_to_ptr.vmem [resolvable:$true] %s33_s22 }
   0x5   :  { %s714_s27 = smov 8   ;;  %s715_s28 = smov [#allocation2]  }
   0x6   :  { %39 = dma.hbm_to_vmem [thread:$0]  %s32_s20, 2048, %s34_s22, [#allocation6], %s713_s26, %s713_s26, %s714_s27  }
   0x7   :  { %s20_s29 = sshll.u32 %s715_s28, 4  ;;  %s716_s1 = smov 64   ;;  %s21_s29 = int_to_ptr.vmem [resolvable:$true] %s20_s29 }
   0x8   :  { %s717_s30 = smov 4   ;;  %s45_s8 = sshll.u32 %s777_s2, 4  ;;  %s46_s8 = int_to_ptr.hbm [resolvable:$true] %s45_s8 }
   0x9   :  { %26 = dma.hbm_to_vmem [thread:$0]  %s19_s25, 128, %s21_s29, [#allocation3], %s716_s1, %s716_s1, %s717_s30  }
   0xa   :  { %s718_s9 = smov [#allocation7]   ;;  %s55_s12 = sshll.u32 %s778_s3, 4  ;;  %s56_s12 = int_to_ptr.hbm [resolvable:$true] %s55_s12 }
   0xb   :  { %s47_s0 = sshll.u32 %s718_s9, 4  ;;  %s719_s13 = smov [#allocation8]   ;;  %s48_s0 = int_to_ptr.vmem [resolvable:$true] %s47_s0 }
   0xc   :  { %50 = dma.hbm_to_vmem [thread:$0]  %s46_s8, 32, %s48_s0, [#allocation6]  }
   0xd   :  { %s57_s14 = sshll.u32 %s719_s13, 4  ;;  %s58_s14 = int_to_ptr.vmem [resolvable:$true] %s57_s14 }
   0xe   :  { %63 = dma.hbm_to_vmem [thread:$0]  %s56_s12, 2048, %s58_s14, [#allocation9], %s716_s1, %s716_s1, %s717_s30  }
   0xf   :  { %704 = dma.done.wait [#allocation3], 128  }
  0x10   :  { %705 = vsyncadd [#allocation3], 4294967168 }
  0x11   :  { %706 = dma.done.wait [#allocation6], 2080  }
  0x12   :  { %707 = vsyncadd [#allocation6], 4294965216 }
  0x13   :  { %708 = dma.done.wait [#allocation9], 2048  }
  0x14   :  { %709 = vsyncadd [#allocation9], 4294965248  ;;  %v471_v0 = vld [vmem:[#allocation5 + $0x70] sm:$0xf]  ;;  %v557_v1 = vld [vmem:[#allocation5 + $0x74] sm:$0xf0] }
  0x15   :  { %v556_v2 = vld [vmem:[#allocation5 + $0x74] sm:$0xf]  ;;  %v472_v3 = vor.u32 %v557_v1, %v471_v0  ;;  %v473_v4 = vld [vmem:[#allocation5 + $0x78] sm:$0xf0]  ;;  %v463_v5 = vld [vmem:[#allocation5 + $0x60] sm:$0xf] }
  0x16   :  { %v555_v6 = vld [vmem:[#allocation5 + $0x64] sm:$0xf0]  ;;  %v476_v7 = vor.u32 %v556_v2, %v473_v4  ;;  %v554_v8 = vld [vmem:[#allocation5 + $0x64] sm:$0xf]  ;;  %v465_v9 = vld [vmem:[#allocation5 + $0x68] sm:$0xf0] }
  0x17   :  { %225 = vmatpush.bf16.msra.mxu0 %v472_v3  ;;  %v464_v10 = vor.u32 %v555_v6, %v463_v5  ;;  %v468_v11 = vor.u32 %v554_v8, %v465_v9  ;;  %v455_v12 = vld [vmem:[#allocation5 + $0x50] sm:$0xf]  ;;  %v553_v13 = vld [vmem:[#allocation5 + $0x54] sm:$0xf0]  ;;  %v552_v14 = vld [vmem:[#allocation5 + $0x54] sm:$0xf] }
  0x18   :  { %239 = vmatpush.bf16.msra.mxu1 %v476_v7  ;;  %v457_v15 = vld [vmem:[#allocation5 + $0x58] sm:$0xf0]  ;;  %v456_v16 = vor.u32 %v553_v13, %v455_v12  ;;  %v447_v18 = vld [vmem:[#allocation5 + $0x40] sm:$0xf]  ;;  %v551_v19 = vld [vmem:[#allocation5 + $0x44] sm:$0xf0] }
  0x19   :  { %v460_v17 = vor.u32 %v552_v14, %v457_v15  ;;  %v550_v20 = vld [vmem:[#allocation5 + $0x44] sm:$0xf]  ;;  %v449_v21 = vld [vmem:[#allocation5 + $0x48] sm:$0xf0]  ;;  %v448_v22 = vor.u32 %v551_v19, %v447_v18  ;;  %v565_v23 = vld [vmem:[#allocation8 + $0x38] sm:$0xff]  ;;  %s720_s15 = smov [#allocation10]  }
  0x1a   :  { %v573_v24 = vld [vmem:[#allocation8 + $0x78] sm:$0xff]  ;;  %v452_v25 = vor.u32 %v550_v20, %v449_v21  ;;  %v439_v26 = vld [vmem:[#allocation5 + $0x30] sm:$0xf]  ;;  %v548_v28 = vld [vmem:[#allocation5 + $0x34] sm:$0xf]  ;;  %358 = vmatpush.bf16.msra.mxu2 %v565_v23  ;;  %s392_s16 = sshll.u32 %s720_s15, 4  ;;  %s393_s16 = int_to_ptr.vmem [resolvable:$true] %s392_s16 }
  0x1b   :  { %226 = vmatpush.bf16.msra.mxu0 %v464_v10  ;;  %v549_v27 = vld [vmem:[#allocation5 + $0x34] sm:$0xf0]  ;;  %v441_v29 = vld [vmem:[#allocation5 + $0x38] sm:$0xf0]  ;;  %372 = vmatpush.bf16.msra.mxu3 %v573_v24  ;;  %v431_v34 = vld [vmem:[#allocation5 + $0x20] sm:$0xf] }
  0x1c   :  { %240 = vmatpush.bf16.msra.mxu1 %v468_v11  ;;  %v564_v30 = vld [vmem:[#allocation8 + $0x30] sm:$0xff]  ;;  %v440_v32 = vor.u32 %v549_v27, %v439_v26  ;;  %v444_v33 = vor.u32 %v548_v28, %v441_v29  ;;  %v547_v35 = vld [vmem:[#allocation5 + $0x24] sm:$0xf0]  ;;  %v546_v36 = vld [vmem:[#allocation5 + $0x24] sm:$0xf]  ;;  %s394_s19 = sshll.u32 %s780_s5, 4  ;;  %s395_s19 = int_to_ptr.hbm [resolvable:$true] %s394_s19 }
  0x1d   :  { %v572_v31 = vld [vmem:[#allocation8 + $0x70] sm:$0xff]  ;;  %v433_v37 = vld [vmem:[#allocation5 + $0x28] sm:$0xf0]  ;;  %v432_v40 = vor.u32 %v547_v35, %v431_v34  ;;  %v425_v45 = vld [vmem:[#allocation5 + $0x18] sm:$0xf0] }
  0x1e   :  { %359 = vmatpush.bf16.msra.mxu2 %v564_v30  ;;  %v563_v38 = vld [vmem:[#allocation8 + $0x28] sm:$0xff]  ;;  %v436_v41 = vor.u32 %v546_v36, %v433_v37  ;;  %v545_v43 = vld [vmem:[#allocation5 + $0x14] sm:$0xf0]  ;;  %v544_v44 = vld [vmem:[#allocation5 + $0x14] sm:$0xf] }
  0x1f   :  { %227 = vmatpush.bf16.msra.mxu0 %v456_v16  ;;  %373 = vmatpush.bf16.msra.mxu3 %v572_v31  ;;  %v571_v39 = vld [vmem:[#allocation8 + $0x68] sm:$0xff]  ;;  %v562_v46 = vld [vmem:[#allocation8 + $0x20] sm:$0xff]  ;;  %v428_v49 = vor.u32 %v544_v44, %v425_v45  ;;  %v541_v56 = vld [vmem:[#allocation2] sm:$0xff] }
  0x20   :  { %241 = vmatpush.bf16.msra.mxu1 %v460_v17  ;;  %v423_v42 = vld [vmem:[#allocation5 + $0x10] sm:$0xf]  ;;  %v570_v47 = vld [vmem:[#allocation8 + $0x60] sm:$0xff]  ;;  %v417_v53 = vld [vmem:[#allocation5 + $0x8] sm:$0xf0] }
  0x21   :  { %v424_v48 = vor.u32 %v545_v43, %v423_v42  ;;  %v415_v50 = vld [vmem:[#allocation5] sm:$0xf]  ;;  %v543_v51 = vld [vmem:[#allocation5 + $0x4] sm:$0xf0]  ;;  %v542_v52 = vld [vmem:[#allocation5 + $0x4] sm:$0xf] }
  0x22   :  { %360 = vmatpush.bf16.msra.mxu2 %v563_v38  ;;  %v416_v54 = vor.u32 %v543_v51, %v415_v50  ;;  %v420_v55 = vor.u32 %v542_v52, %v417_v53  ;;  %v561_v57 = vld [vmem:[#allocation8 + $0x18] sm:$0xff]  ;;  %v560_v59 = vld [vmem:[#allocation8 + $0x10] sm:$0xff]  ;;  %v559_v61 = vld [vmem:[#allocation8 + $0x8] sm:$0xff] }
  0x23   :  { %228 = vmatpush.bf16.msra.mxu0 %v448_v22  ;;  %374 = vmatpush.bf16.msra.mxu3 %v571_v39  ;;  %v569_v58 = vld [vmem:[#allocation8 + $0x58] sm:$0xff]  ;;  %v568_v60 = vld [vmem:[#allocation8 + $0x50] sm:$0xff]  ;;  %v567_v62 = vld [vmem:[#allocation8 + $0x48] sm:$0xff] }
  0x24   :  { %242 = vmatpush.bf16.msra.mxu1 %v452_v25  ;;  %v558_v63 = vld [vmem:[#allocation8] sm:$0xff]  ;;  %v132_v1 = vld [vmem:[#allocation7] sm:$0x3]  ;;  %v583_v18 = vld [vmem:[%s779_s4] ss:$0 sm:$0xff] }
  0x25   :  { %v566_v0 = vld [vmem:[#allocation8 + $0x40] sm:$0xff]  ;;  %v135_v4 = vperm.slane %v132_v1, 0  ;;  %v136_v5 = vperm.slane %v132_v1, 1 }
  0x26   :  { %361 = vmatpush.bf16.msra.mxu2 %v562_v46 }
  0x27   :  { %229 = vmatpush.bf16.msra.mxu0 %v440_v32  ;;  %375 = vmatpush.bf16.msra.mxu3 %v570_v47 }
  0x28   :  { %243 = vmatpush.bf16.msra.mxu1 %v444_v33 }
  0x2a   :  { %362 = vmatpush.bf16.msra.mxu2 %v561_v57 }
  0x2b   :  { %230 = vmatpush.bf16.msra.mxu0 %v432_v40  ;;  %376 = vmatpush.bf16.msra.mxu3 %v569_v58 }
  0x2c   :  { %244 = vmatpush.bf16.msra.mxu1 %v436_v41 }
  0x2e   :  { %363 = vmatpush.bf16.msra.mxu2 %v560_v59 }
  0x2f   :  { %231 = vmatpush.bf16.msra.mxu0 %v424_v48  ;;  %377 = vmatpush.bf16.msra.mxu3 %v568_v60 }
  0x30   :  { %245 = vmatpush.bf16.msra.mxu1 %v428_v49 }
  0x32   :  { %364 = vmatpush.bf16.msra.mxu2 %v559_v61 }
  0x33   :  { %232 = vmatpush.bf16.msra.mxu0 %v416_v54  ;;  %378 = vmatpush.bf16.msra.mxu3 %v567_v62 }
  0x34   :  { %246 = vmatpush.bf16.msra.mxu1 %v420_v55 }
  0x36   :  { %233 = vmatmul.bf16.vlgmr.msra.gmra.mxu0 %v541_v56  ;;  %365 = vmatpush.bf16.msra.mxu2 %v558_v63 }
  0x37   :  { %247 = vmatmul.bf16.vlgmr.msra.gmra.mxu1 %v541_v56  ;;  %379 = vmatpush.bf16.msra.mxu3 %v566_v0 }
  0xb3   :  { %v234_v2 = vpop.f32.mrf.mxu0 }
  0xb4   :  { %v248_v3 = vpop.f32.mrf.mxu1  ;;  %v235_v6 = vadd.f32 %v234_v2, %v135_v4 }
  0xb5   :  { %v249_v7 = vadd.f32 %v248_v3, %v136_v5 }
  0xb6   :  { %v253_v12 = vmax.f32 %v235_v6, 0.0 }
  0xb7   :  { %v254_v14 = vmax.f32 %v249_v7, 0.0 }
  0xbb   :  { %v236_v8 = vpop.f32.mrf.mxu0 }
  0xbc   :  { %v237_v9 = vadd.f32 %v236_v8, %v135_v4  ;;  %v250_v10 = vpop.f32.mrf.mxu1 }
  0xbd   :  { %v251_v11 = vadd.f32 %v250_v10, %v136_v5 }
  0xbe   :  { %v255_v13 = vmax.f32 %v237_v9, 0.0 }
  0xbf   :  { %v256_v15 = vmax.f32 %v251_v11, 0.0 }
  0xc0   :  { %v257_v16 = vpack.c.bf16 %v255_v13, %v253_v12 }
  0xc1   :  { %v258_v17 = vpack.c.bf16 %v256_v15, %v254_v14 }
  0xc2   :  { %366 = vmatmul.bf16.vlgmr.msra.gmra.mxu2 %v257_v16 }
  0xc3   :  { %380 = vmatmul.bf16.vlgmr.msra.gmra.mxu3 %v258_v17 }
 0x145   :  { %v367_v19 = vpop.f32.mrf.mxu2 }
 0x146   :  { %v368_v20 = vadd.f32 %v583_v18, %v367_v19  ;;  %v381_v21 = vpop.f32.mrf.mxu3 }
 0x148   :  { %v382_v22 = vadd.f32 %v381_v21, %v368_v20 }
 0x14a   :  { %386 = vst [vmem:[#allocation10] sm:$0xff] %v382_v22 }
 0x14d   :  { %v369_v23 = vpop.f32.mrf.mxu2 }
 0x14e   :  { %v370_v24 = vadd.f32 %v583_v18, %v369_v23  ;;  %v383_v25 = vpop.f32.mrf.mxu3 }
 0x150   :  { %v384_v26 = vadd.f32 %v383_v25, %v370_v24 }
 0x152   :  { %387 = vst [vmem:[#allocation10 + $0x8] sm:$0xff] %v384_v26 }
 0x153   :  { %400 = dma.vmem_to_hbm [thread:$0]  %s393_s16, 256, %s395_s19, [#allocation4], %s713_s26, %s713_s26, %s714_s27  }
 0x154   :  { %710 = dma.done.wait [#allocation4], 256  }
 0x155   :  { %711 = vsyncadd [#allocation4], 4294967040 }
 0x156   :  { %405 = vsyncpa [#allocation3], 1 }
 0x157   :  { %406 = vsyncpa [#allocation6], 1 }
 0x158   :  { %407 = vsyncpa [#allocation9], 1 }
 0x159   :  { %408 = vsyncpa [#allocation4], 1 }

// kernel: tpu_custom_call.1
= control target key start
LH: loop header
LB: loop body
LE: loop exit
PB: predicated region body
PF: predicated region fallthrough
CT: control target
= control target key end

     0   :  { %10 = vsyncpa [#allocation3], 0  ;;  %s775_s0 = inlined_call_operand.hbm [shape: bf16[16,128], index: 0, kind: input, shape index: {}]   ;;  %s776_s1 = inlined_call_operand.hbm [shape: bf16[128,256], index: 1, kind: input, shape index: {}]   ;;  %s777_s2 = inlined_call_operand.hbm [shape: f32[1,256], index: 2, kind: input, shape index: {}]   ;;  %s778_s3 = inlined_call_operand.hbm [shape: bf16[256,128], index: 3, kind: input, shape index: {}]   ;;  %s779_s4 = inlined_call_operand.vmem [shape: f32[1,128], index: 4, kind: input, shape index: {}]   ;;  %s780_s5 = inlined_call_operand.hbm [shape: f32[16,128], index: 5, kind: output, shape index: {}]  }
   0x1   :  { %11 = vsyncpa [#allocation6], 0 }
   0x2   :  { %12 = vsyncpa [#allocation9], 0  ;;  %s31_s20 = sshll.u32 %s776_s1, 4  ;;  %s32_s20 = int_to_ptr.hbm [resolvable:$true] %s31_s20 }
   0x3   :  { %13 = vsyncpa [#allocation4], 0  ;;  %s712_s21 = smov [#allocation5]   ;;  %s18_s25 = sshll.u32 %s775_s0, 4  ;;  %s19_s25 = int_to_ptr.hbm [resolvable:$true] %s18_s25 }
   0x4   :  { %s33_s22 = sshll.u32 %s712_s21, 4  ;;  %s713_s26 = smov 128   ;;  %s34_s22 = int_to_ptr.vmem [resolvable:$true] %s33_s22 }
   0x5   :  { %s714_s27 = smov 8   ;;  %s715_s28 = smov [#allocation2]  }
   0x6   :  { %39 = dma.hbm_to_vmem [thread:$0]  %s32_s20, 2048, %s34_s22, [#allocation6], %s713_s26, %s713_s26, %s714_s27  }
   0x7   :  { %s20_s29 = sshll.u32 %s715_s28, 4  ;;  %s716_s1 = smov 64   ;;  %s21_s29 = int_to_ptr.vmem [resolvable:$true] %s20_s29 }
   0x8   :  { %s717_s30 = smov 4   ;;  %s45_s8 = sshll.u32 %s777_s2, 4  ;;  %s46_s8 = int_to_ptr.hbm [resolvable:$true] %s45_s8 }
   0x9   :  { %26 = dma.hbm_to_vmem [thread:$0]  %s19_s25, 128, %s21_s29, [#allocation3], %s716_s1, %s716_s1, %s717_s30  }
   0xa   :  { %s718_s9 = smov [#allocation7]   ;;  %s55_s12 = sshll.u32 %s778_s3, 4  ;;  %s56_s12 = int_to_ptr.hbm [resolvable:$true] %s55_s12 }
   0xb   :  { %s47_s0 = sshll.u32 %s718_s9, 4  ;;  %s719_s13 = smov [#allocation8]   ;;  %s48_s0 = int_to_ptr.vmem [resolvable:$true] %s47_s0 }
   0xc   :  { %50 = dma.hbm_to_vmem [thread:$0]  %s46_s8, 32, %s48_s0, [#allocation6]  }
   0xd   :  { %s57_s14 = sshll.u32 %s719_s13, 4  ;;  %s58_s14 = int_to_ptr.vmem [resolvable:$true] %s57_s14 }
   0xe   :  { %63 = dma.hbm_to_vmem [thread:$0]  %s56_s12, 2048, %s58_s14, [#allocation9], %s716_s1, %s716_s1, %s717_s30  }
   0xf   :  { %704 = dma.done.wait [#allocation3], 128  }
  0x10   :  { %705 = vsyncadd [#allocation3], 4294967168 }
  0x11   :  { %706 = dma.done.wait [#allocation6], 2080  }
  0x12   :  { %707 = vsyncadd [#allocation6], 4294965216 }
  0x13   :  { %708 = dma.done.wait [#allocation9], 2048  }
  0x14   :  { %709 = vsyncadd [#allocation9], 4294965248  ;;  %v471_v0 = vld [vmem:[#allocation5 + $0x70] sm:$0xf]  ;;  %v557_v1 = vld [vmem:[#allocation5 + $0x74] sm:$0xf0] }
  0x15   :  { %v556_v2 = vld [vmem:[#allocation5 + $0x74] sm:$0xf]  ;;  %v472_v3 = vor.u32 %v557_v1, %v471_v0  ;;  %v473_v4 = vld [vmem:[#allocation5 + $0x78] sm:$0xf0]  ;;  %v463_v5 = vld [vmem:[#allocation5 + $0x60] sm:$0xf] }
  0x16   :  { %v555_v6 = vld [vmem:[#allocation5 + $0x64] sm:$0xf0]  ;;  %v476_v7 = vor.u32 %v556_v2, %v473_v4  ;;  %v554_v8 = vld [vmem:[#allocation5 + $0x64] sm:$0xf]  ;;  %v465_v9 = vld [vmem:[#allocation5 + $0x68] sm:$0xf0] }
  0x17   :  { %225 = vmatpush.bf16.msra.mxu0 %v472_v3  ;;  %v464_v10 = vor.u32 %v555_v6, %v463_v5  ;;  %v468_v11 = vor.u32 %v554_v8, %v465_v9  ;;  %v455_v12 = vld [vmem:[#allocation5 + $0x50] sm:$0xf]  ;;  %v553_v13 = vld [vmem:[#allocation5 + $0x54] sm:$0xf0]  ;;  %v552_v14 = vld [vmem:[#allocation5 + $0x54] sm:$0xf] }
  0x18   :  { %239 = vmatpush.bf16.msra.mxu1 %v476_v7  ;;  %v457_v15 = vld [vmem:[#allocation5 + $0x58] sm:$0xf0]  ;;  %v456_v16 = vor.u32 %v553_v13, %v455_v12  ;;  %v447_v18 = vld [vmem:[#allocation5 + $0x40] sm:$0xf]  ;;  %v551_v19 = vld [vmem:[#allocation5 + $0x44] sm:$0xf0] }
  0x19   :  { %v460_v17 = vor.u32 %v552_v14, %v457_v15  ;;  %v550_v20 = vld [vmem:[#allocation5 + $0x44] sm:$0xf]  ;;  %v449_v21 = vld [vmem:[#allocation5 + $0x48] sm:$0xf0]  ;;  %v448_v22 = vor.u32 %v551_v19, %v447_v18  ;;  %v565_v23 = vld [vmem:[#allocation8 + $0x38] sm:$0xff]  ;;  %s720_s15 = smov [#allocation10]  }
  0x1a   :  { %v573_v24 = vld [vmem:[#allocation8 + $0x78] sm:$0xff]  ;;  %v452_v25 = vor.u32 %v550_v20, %v449_v21  ;;  %v439_v26 = vld [vmem:[#allocation5 + $0x30] sm:$0xf]  ;;  %v548_v28 = vld [vmem:[#allocation5 + $0x34] sm:$0xf]  ;;  %358 = vmatpush.bf16.msra.mxu2 %v565_v23  ;;  %s392_s16 = sshll.u32 %s720_s15, 4  ;;  %s393_s16 = int_to_ptr.vmem [resolvable:$true] %s392_s16 }
  0x1b   :  { %226 = vmatpush.bf16.msra.mxu0 %v464_v10  ;;  %v549_v27 = vld [vmem:[#allocation5 + $0x34] sm:$0xf0]  ;;  %v441_v29 = vld [vmem:[#allocation5 + $0x38] sm:$0xf0]  ;;  %372 = vmatpush.bf16.msra.mxu3 %v573_v24  ;;  %v431_v34 = vld [vmem:[#allocation5 + $0x20] sm:$0xf] }
  0x1c   :  { %240 = vmatpush.bf16.msra.mxu1 %v468_v11  ;;  %v564_v30 = vld [vmem:[#allocation8 + $0x30] sm:$0xff]  ;;  %v440_v32 = vor.u32 %v549_v27, %v439_v26  ;;  %v444_v33 = vor.u32 %v548_v28, %v441_v29  ;;  %v547_v35 = vld [vmem:[#allocation5 + $0x24] sm:$0xf0]  ;;  %v546_v36 = vld [vmem:[#allocation5 + $0x24] sm:$0xf]  ;;  %s394_s19 = sshll.u32 %s780_s5, 4  ;;  %s395_s19 = int_to_ptr.hbm [resolvable:$true] %s394_s19 }
  0x1d   :  { %v572_v31 = vld [vmem:[#allocation8 + $0x70] sm:$0xff]  ;;  %v433_v37 = vld [vmem:[#allocation5 + $0x28] sm:$0xf0]  ;;  %v432_v40 = vor.u32 %v547_v35, %v431_v34  ;;  %v425_v45 = vld [vmem:[#allocation5 + $0x18] sm:$0xf0] }
  0x1e   :  { %359 = vmatpush.bf16.msra.mxu2 %v564_v30  ;;  %v563_v38 = vld [vmem:[#allocation8 + $0x28] sm:$0xff]  ;;  %v436_v41 = vor.u32 %v546_v36, %v433_v37  ;;  %v545_v43 = vld [vmem:[#allocation5 + $0x14] sm:$0xf0]  ;;  %v544_v44 = vld [vmem:[#allocation5 + $0x14] sm:$0xf] }
  0x1f   :  { %227 = vmatpush.bf16.msra.mxu0 %v456_v16  ;;  %373 = vmatpush.bf16.msra.mxu3 %v572_v31  ;;  %v571_v39 = vld [vmem:[#allocation8 + $0x68] sm:$0xff]  ;;  %v562_v46 = vld [vmem:[#allocation8 + $0x20] sm:$0xff]  ;;  %v428_v49 = vor.u32 %v544_v44, %v425_v45  ;;  %v541_v56 = vld [vmem:[#allocation2] sm:$0xff] }
  0x20   :  { %241 = vmatpush.bf16.msra.mxu1 %v460_v17  ;;  %v423_v42 = vld [vmem:[#allocation5 + $0x10] sm:$0xf]  ;;  %v570_v47 = vld [vmem:[#allocation8 + $0x60] sm:$0xff]  ;;  %v417_v53 = vld [vmem:[#allocation5 + $0x8] sm:$0xf0] }
  0x21   :  { %v424_v48 = vor.u32 %v545_v43, %v423_v42  ;;  %v415_v50 = vld [vmem:[#allocation5] sm:$0xf]  ;;  %v543_v51 = vld [vmem:[#allocation5 + $0x4] sm:$0xf0]  ;;  %v542_v52 = vld [vmem:[#allocation5 + $0x4] sm:$0xf] }
  0x22   :  { %360 = vmatpush.bf16.msra.mxu2 %v563_v38  ;;  %v416_v54 = vor.u32 %v543_v51, %v415_v50  ;;  %v420_v55 = vor.u32 %v542_v52, %v417_v53  ;;  %v561_v57 = vld [vmem:[#allocation8 + $0x18] sm:$0xff]  ;;  %v560_v59 = vld [vmem:[#allocation8 + $0x10] sm:$0xff]  ;;  %v559_v61 = vld [vmem:[#allocation8 + $0x8] sm:$0xff] }
  0x23   :  { %228 = vmatpush.bf16.msra.mxu0 %v448_v22  ;;  %374 = vmatpush.bf16.msra.mxu3 %v571_v39  ;;  %v569_v58 = vld [vmem:[#allocation8 + $0x58] sm:$0xff]  ;;  %v568_v60 = vld [vmem:[#allocation8 + $0x50] sm:$0xff]  ;;  %v567_v62 = vld [vmem:[#allocation8 + $0x48] sm:$0xff] }
  0x24   :  { %242 = vmatpush.bf16.msra.mxu1 %v452_v25  ;;  %v558_v63 = vld [vmem:[#allocation8] sm:$0xff]  ;;  %v132_v1 = vld [vmem:[#allocation7] sm:$0x3]  ;;  %v583_v18 = vld [vmem:[%s779_s4] ss:$0 sm:$0xff] }
  0x25   :  { %v566_v0 = vld [vmem:[#allocation8 + $0x40] sm:$0xff]  ;;  %v135_v4 = vperm.slane %v132_v1, 0  ;;  %v136_v5 = vperm.slane %v132_v1, 1 }
  0x26   :  { %361 = vmatpush.bf16.msra.mxu2 %v562_v46 }
  0x27   :  { %229 = vmatpush.bf16.msra.mxu0 %v440_v32  ;;  %375 = vmatpush.bf16.msra.mxu3 %v570_v47 }
  0x28   :  { %243 = vmatpush.bf16.msra.mxu1 %v444_v33 }
  0x2a   :  { %362 = vmatpush.bf16.msra.mxu2 %v561_v57 }
  0x2b   :  { %230 = vmatpush.bf16.msra.mxu0 %v432_v40  ;;  %376 = vmatpush.bf16.msra.mxu3 %v569_v58 }
  0x2c   :  { %244 = vmatpush.bf16.msra.mxu1 %v436_v41 }
  0x2e   :  { %363 = vmatpush.bf16.msra.mxu2 %v560_v59 }
  0x2f   :  { %231 = vmatpush.bf16.msra.mxu0 %v424_v48  ;;  %377 = vmatpush.bf16.msra.mxu3 %v568_v60 }
  0x30   :  { %245 = vmatpush.bf16.msra.mxu1 %v428_v49 }
  0x32   :  { %364 = vmatpush.bf16.msra.mxu2 %v559_v61 }
  0x33   :  { %232 = vmatpush.bf16.msra.mxu0 %v416_v54  ;;  %378 = vmatpush.bf16.msra.mxu3 %v567_v62 }
  0x34   :  { %246 = vmatpush.bf16.msra.mxu1 %v420_v55 }
  0x36   :  { %233 = vmatmul.bf16.vlgmr.msra.gmra.mxu0 %v541_v56  ;;  %365 = vmatpush.bf16.msra.mxu2 %v558_v63 }
  0x37   :  { %247 = vmatmul.bf16.vlgmr.msra.gmra.mxu1 %v541_v56  ;;  %379 = vmatpush.bf16.msra.mxu3 %v566_v0 }
  0xb3   :  { %v234_v2 = vpop.f32.mrf.mxu0 }
  0xb4   :  { %v248_v3 = vpop.f32.mrf.mxu1  ;;  %v235_v6 = vadd.f32 %v234_v2, %v135_v4 }
  0xb5   :  { %v249_v7 = vadd.f32 %v248_v3, %v136_v5 }
  0xb6   :  { %v253_v12 = vmax.f32 %v235_v6, 0.0 }
  0xb7   :  { %v254_v14 = vmax.f32 %v249_v7, 0.0 }
  0xbb   :  { %v236_v8 = vpop.f32.mrf.mxu0 }
  0xbc   :  { %v237_v9 = vadd.f32 %v236_v8, %v135_v4  ;;  %v250_v10 = vpop.f32.mrf.mxu1 }
  0xbd   :  { %v251_v11 = vadd.f32 %v250_v10, %v136_v5 }
  0xbe   :  { %v255_v13 = vmax.f32 %v237_v9, 0.0 }
  0xbf   :  { %v256_v15 = vmax.f32 %v251_v11, 0.0 }
  0xc0   :  { %v257_v16 = vpack.c.bf16 %v255_v13, %v253_v12 }
  0xc1   :  { %v258_v17 = vpack.c.bf16 %v256_v15, %v254_v14 }
  0xc2   :  { %366 = vmatmul.bf16.vlgmr.msra.gmra.mxu2 %v257_v16 }
  0xc3   :  { %380 = vmatmul.bf16.vlgmr.msra.gmra.mxu3 %v258_v17 }
 0x145   :  { %v367_v19 = vpop.f32.mrf.mxu2 }
 0x146   :  { %v368_v20 = vadd.f32 %v583_v18, %v367_v19  ;;  %v381_v21 = vpop.f32.mrf.mxu3 }
 0x148   :  { %v382_v22 = vadd.f32 %v381_v21, %v368_v20 }
 0x14a   :  { %386 = vst [vmem:[#allocation10] sm:$0xff] %v382_v22 }
 0x14d   :  { %v369_v23 = vpop.f32.mrf.mxu2 }
 0x14e   :  { %v370_v24 = vadd.f32 %v583_v18, %v369_v23  ;;  %v383_v25 = vpop.f32.mrf.mxu3 }
 0x150   :  { %v384_v26 = vadd.f32 %v383_v25, %v370_v24 }
 0x152   :  { %387 = vst [vmem:[#allocation10 + $0x8] sm:$0xff] %v384_v26 }
 0x153   :  { %400 = dma.vmem_to_hbm [thread:$0]  %s393_s16, 256, %s395_s19, [#allocation4], %s713_s26, %s713_s26, %s714_s27  }
 0x154   :  { %710 = dma.done.wait [#allocation4], 256  }
 0x155   :  { %711 = vsyncadd [#allocation4], 4294967040 }
 0x156   :  { %405 = vsyncpa [#allocation3], 1 }
 0x157   :  { %406 = vsyncpa [#allocation6], 1 }
 0x158   :  { %407 = vsyncpa [#allocation9], 1 }
 0x159   :  { %408 = vsyncpa [#allocation4], 1 }

</bundles_post_ra>
